<compile_context>
chip_gen: v6e
topology: v6e:2x2x1
jax: 0.10.0
libtpu: 0.0.40
codegen_flags: <defaults>
</compile_context>

<pallas_src>
import math

import jax
import jax.numpy as jnp
from jax.experimental import pallas as pl
from jax.experimental.pallas import tpu as pltpu


def _round_up(x: int, m: int) -> int:
    return ((x + m - 1) // m) * m


def _vmem_budget_bytes() -> int:
    """Generation-aware VMEM budget: 75% of physical VMEM (headroom for Mosaic internal
    scratch and double-buffers); conservative 48 MiB fallback (fits v7x's 64 MiB)."""
    try:
        info = pltpu.get_tpu_info()
        cap = getattr(info, "vmem_capacity_bytes", None)
        if cap:
            return int(cap) * 3 // 4
    except Exception:
        pass
    return 48 * 1024 * 1024


def two_layer_fc_kernel(x_ref, w1_ref, b1_ref, w2_ref, b2_ref, o_ref):
    # Cast the f32 activation tile to the matmul dtype in-kernel (VPU work hidden under
    # the MXU work of neighbouring tiles) instead of a separate HBM cast pass over x.
    x = x_ref[...].astype(w1_ref.dtype)
    # fc1: (TM, D) @ (D, Hid) -> f32 accumulation; bias + ReLU on the VPU.
    h = jnp.dot(x, w1_ref[...], preferred_element_type=jnp.float32)
    h = jnp.maximum(h + b1_ref[...], 0.0)            # b1 is (1, Hid) -> broadcasts over TM
    # fc2: (TM, Hid) @ (Hid, Cls) -> f32 accumulation.
    s = jnp.dot(h.astype(w2_ref.dtype), w2_ref[...], preferred_element_type=jnp.float32)
    o_ref[...] = (s + b2_ref[...]).astype(o_ref.dtype)


def prepare_params(w1, b1, w2, b2, *, mm_dtype=jnp.bfloat16):
    """One-time cast + lane-pad of weights/biases (hoisted out of the per-call path).
    Zero-padding Hid/Cls is numerically exact through bias-add and ReLU.
    w1: [D, Hid], w2: [Hid, Cls] (stored transposed for the kernel's x @ W layout)."""
    d, hid = w1.shape
    cls = w2.shape[1]
    hid_pad = _round_up(hid, 128)
    cls_pad = _round_up(cls, 128)
    w1p = jnp.pad(w1.astype(mm_dtype), ((0, 0), (0, hid_pad - hid)))
    b1p = jnp.pad(b1.astype(jnp.float32), (0, hid_pad - hid)).reshape(1, hid_pad)
    w2p = jnp.pad(w2.astype(mm_dtype), ((0, hid_pad - hid), (0, cls_pad - cls)))
    b2p = jnp.pad(b2.astype(jnp.float32), (0, cls_pad - cls)).reshape(1, cls_pad)
    return w1p, b1p, w2p, b2p, cls


def _resident_spec(shape, buffered):
    """BlockSpec for a grid-invariant (VMEM-resident) operand."""
    index_map = lambda i: (0,) * len(shape)
    if buffered:
        # Single buffer: the block index never changes, so no double-buffer needed.
        return pl.BlockSpec(shape, index_map, pipeline_mode=pl.Buffered(1))
    return pl.BlockSpec(shape, index_map)


def two_layer_fc(x, params):
    """x: [N, C, H, W] float32. params: output of prepare_params(). Returns [N, Cls] f32."""
    w1p, b1p, w2p, b2p, cls = params
    n = x.shape[0]
    x_flat = x.reshape(n, -1)                         # flatten(x) — glue in JAX (a reshape)
    d = x_flat.shape[1]
    assert w1p.shape[0] == d, "input_size mismatch between x and fc1 weights"
    hid_pad = w1p.shape[1]
    cls_pad = w2p.shape[1]
    mm_bytes = jnp.dtype(w1p.dtype).itemsize
    x_bytes = jnp.dtype(x_flat.dtype).itemsize

    budget = _vmem_budget_bytes()

    # Per-step VMEM: double-buffered x/out tiles + resident weights/biases
    # (weights counted double-buffered as the worst case, in case Buffered(1) falls back).
    def vmem_est(tm):
        return (2 * tm * d * x_bytes                  # x tiles (f32, double-buffered)
                + 2 * tm * cls_pad * 4                # out tiles (f32, double-buffered)
                + 2 * d * hid_pad * mm_bytes          # w1 (resident)
                + 2 * hid_pad * cls_pad * mm_bytes    # w2 (resident)
                + 2 * (hid_pad + cls_pad) * 4)        # biases

    # Largest batch tile (up to 1024 rows) that fits the VMEM budget and the batch.
    tm_cap = max(8, _round_up(n, 8))
    tm = 8
    for cand in (1024, 512, 256, 128, 64, 32, 16, 8):
        if cand <= tm_cap and vmem_est(cand) <= budget:
            tm = cand
            break
    # TODO(synk): if even tm=8 does not fit (very large D*Hid on v7x), K-tile fc1 over D
    # with an f32 accumulator scratch + pl.when init/finalize instead of resident w1.

    grid = (pl.cdiv(n, tm),)      # ragged last tile handled by Pallas; no batch-pad pass

    cost = pl.CostEstimate(
        flops=2 * n * d * hid_pad + 2 * n * hid_pad * cls_pad,
        transcendentals=0,
        bytes_accessed=(n * d * x_bytes
                        + d * hid_pad * mm_bytes
                        + hid_pad * cls_pad * mm_bytes
                        + (hid_pad + cls_pad) * 4
                        + n * cls_pad * 4),
    )

    def build(buffered):
        return pl.pallas_call(
            two_layer_fc_kernel,
            out_shape=jax.ShapeDtypeStruct((n, cls_pad), jnp.float32),
            grid=grid,
            in_specs=[
                pl.BlockSpec((tm, d), lambda i: (i, 0)),       # x: walks the batch axis
                _resident_spec((d, hid_pad), buffered),        # w1: VMEM-resident
                _resident_spec((1, hid_pad), buffered),        # b1
                _resident_spec((hid_pad, cls_pad), buffered),  # w2
                _resident_spec((1, cls_pad), buffered),        # b2
            ],
            out_specs=pl.BlockSpec((tm, cls_pad), lambda i: (i, 0)),
            compiler_params=pltpu.CompilerParams(
                # TODO(synk): on v7x try pltpu.CORE_PARALLEL (or an explicit core_map
                # split) so both TensorCores each take half of the batch tiles.
                dimension_semantics=("parallel",),
                vmem_limit_bytes=int(budget),
            ),
            cost_estimate=cost,
        )

    try:
        out = build(buffered=True)(x_flat, w1p, b1p, w2p, b2p)
    except Exception:
        # pipeline_mode=pl.Buffered(1) unsupported on this JAX/Mosaic build — fall back
        # to default double-buffering of the (small) resident weights.
        out = build(buffered=False)(x_flat, w1p, b1p, w2p, b2p)

    # TODO(synk): for inference pipelines, return the lane-padded (N, cls_pad) scores
    # (or bf16) and fuse this slice into the consumer instead of a separate XLA copy.
    return out[:, :cls]


def init_params(key, input_size, hidden_size, num_classes):
    """Deterministic init mirroring the PyTorch module:
    - fc weights: kaiming_normal_ (std = sqrt(2 / fan_in))
    - fc biases:  nn.Linear default uniform(-1/sqrt(fan_in), 1/sqrt(fan_in))
    Weights are stored transposed ([in, out]) for the kernel's x @ W layout."""
    k1, k2, k3, k4 = jax.random.split(key, 4)

    std1 = math.sqrt(2.0 / input_size)
    w1 = jax.random.normal(k1, (input_size, hidden_size), jnp.float32) * std1
    bound1 = 1.0 / math.sqrt(input_size)
    b1 = jax.random.uniform(k2, (hidden_size,), jnp.float32, -bound1, bound1)

    std2 = math.sqrt(2.0 / hidden_size)
    w2 = jax.random.normal(k3, (hidden_size, num_classes), jnp.float32) * std2
    bound2 = 1.0 / math.sqrt(hidden_size)
    b2 = jax.random.uniform(k4, (num_classes,), jnp.float32, -bound2, bound2)

    return w1, b1, w2, b2


if __name__ == "__main__":
    # Small shapes consistent with the forward: x is NCHW, input_size = C*H*W.
    N, C, H, W = 2, 4, 16, 16
    input_size = C * H * W        # 1024
    hidden_size = 32
    num_classes = 10

    key = jax.random.PRNGKey(0)
    kx, kp = jax.random.split(key)
    x = jax.random.normal(kx, (N, C, H, W), jnp.float32)
    w1, b1, w2, b2 = init_params(kp, input_size, hidden_size, num_classes)

    params = prepare_params(w1, b1, w2, b2)   # one-time cast+pad (reused across forwards)
    scores = two_layer_fc(x, params)
    scores = jax.block_until_ready(scores)
    assert scores.shape == (N, num_classes)

    # Pure-JAX reference with the same bf16 operand quantization + f32 accumulation
    # (matches the kernel's MXU numerics, including the in-kernel casts).
    x_flat = x.reshape(N, -1)
    xb = x_flat.astype(jnp.bfloat16).astype(jnp.float32)
    w1b = w1.astype(jnp.bfloat16).astype(jnp.float32)
    w2b = w2.astype(jnp.bfloat16).astype(jnp.float32)
    hb = jnp.maximum(xb @ w1b + b1, 0.0)
    ref_bf16 = hb.astype(jnp.bfloat16).astype(jnp.float32) @ w2b + b2
    assert jnp.allclose(scores, ref_bf16, atol=5e-3, rtol=5e-3)

    # Looser sanity check against the full-f32 reference of the original module.
    ref_f32 = jnp.maximum(x_flat @ w1 + b1, 0.0) @ w2 + b2
    assert jnp.allclose(scores, ref_f32, atol=5e-2, rtol=5e-2)

    print("KERNEL_OK")
</pallas_src>

<mosaic_0001>
module attributes {stable_mosaic.version = 11 : i64} {
  func.func @two_layer_fc_kernel(%arg0: i32, %arg1: memref<8x1024xf32, #tpu.memory_space<vmem>>, %arg2: memref<1024x128xbf16, #tpu.memory_space<vmem>>, %arg3: memref<1x128xf32, #tpu.memory_space<vmem>>, %arg4: memref<128x128xbf16, #tpu.memory_space<vmem>>, %arg5: memref<1x128xf32, #tpu.memory_space<vmem>>, %arg6: memref<8x128xf32, #tpu.memory_space<vmem>>) attributes {dimension_semantics = [#tpu.dimension_semantics<parallel>], iteration_bounds = array<i64: 1>, scalar_prefetch = 0 : i64, scratch_operands = 0 : i64, tpu.core_type = #tpu.core_type<tc>, window_params = [{transform_indices = @transform_0, window_bounds = array<i64: 8, 1024>}, {pipeline_mode = #tpu.pipeline_mode<synchronous>, transform_indices = @transform_1, window_bounds = array<i64: 1024, 128>}, {pipeline_mode = #tpu.pipeline_mode<synchronous>, transform_indices = @transform_2, window_bounds = array<i64: 1, 128>}, {pipeline_mode = #tpu.pipeline_mode<synchronous>, transform_indices = @transform_3, window_bounds = array<i64: 128, 128>}, {pipeline_mode = #tpu.pipeline_mode<synchronous>, transform_indices = @transform_4, window_bounds = array<i64: 1, 128>}, {transform_indices = @transform_5, window_bounds = array<i64: 8, 128>}]} {
    %c0 = arith.constant 0 : index
    %c0_0 = arith.constant 0 : index
    %0 = vector.load %arg1[%c0, %c0_0] : memref<8x1024xf32, #tpu.memory_space<vmem>>, vector<8x1024xf32>
    %1 = arith.truncf %0 : vector<8x1024xf32> to vector<8x1024xbf16>
    %c0_1 = arith.constant 0 : index
    %c0_2 = arith.constant 0 : index
    %2 = vector.load %arg2[%c0_1, %c0_2] : memref<1024x128xbf16, #tpu.memory_space<vmem>>, vector<1024x128xbf16>
    %cst = arith.constant dense<0.000000e+00> : vector<8x128xf32>
    %3 = tpu.matmul %1, %2, %cst {dimension_numbers = #tpu.dot_dimension_numbers<[1], [0], [0], [1], [0, 0, 1, 1], [], []>} : vector<8x1024xbf16>, vector<1024x128xbf16>, vector<8x128xf32> -> vector<8x128xf32>
    %c0_3 = arith.constant 0 : index
    %c0_4 = arith.constant 0 : index
    %4 = vector.load %arg3[%c0_3, %c0_4] : memref<1x128xf32, #tpu.memory_space<vmem>>, vector<1x128xf32>
    %5 = vector.broadcast %4 : vector<1x128xf32> to vector<8x128xf32>
    %6 = arith.addf %3, %5 : vector<8x128xf32>
    %cst_5 = arith.constant 0.000000e+00 : f32
    %7 = vector.broadcast %cst_5 : f32 to vector<8x128xf32>
    %8 = arith.maximumf %6, %7 : vector<8x128xf32>
    %9 = arith.truncf %8 : vector<8x128xf32> to vector<8x128xbf16>
    %c0_6 = arith.constant 0 : index
    %c0_7 = arith.constant 0 : index
    %10 = vector.load %arg4[%c0_6, %c0_7] : memref<128x128xbf16, #tpu.memory_space<vmem>>, vector<128x128xbf16>
    %cst_8 = arith.constant dense<0.000000e+00> : vector<8x128xf32>
    %11 = tpu.matmul %9, %10, %cst_8 {dimension_numbers = #tpu.dot_dimension_numbers<[1], [0], [0], [1], [0, 0, 1, 1], [], []>} : vector<8x128xbf16>, vector<128x128xbf16>, vector<8x128xf32> -> vector<8x128xf32>
    %c0_9 = arith.constant 0 : index
    %c0_10 = arith.constant 0 : index
    %12 = vector.load %arg5[%c0_9, %c0_10] : memref<1x128xf32, #tpu.memory_space<vmem>>, vector<1x128xf32>
    %13 = vector.broadcast %12 : vector<1x128xf32> to vector<8x128xf32>
    %14 = arith.addf %11, %13 : vector<8x128xf32>
    %c0_11 = arith.constant 0 : index
    %c0_12 = arith.constant 0 : index
    %15 = vector.load %arg6[%c0_11, %c0_12] : memref<8x128xf32, #tpu.memory_space<vmem>>, vector<8x128xf32>
    tpu.vector_store %arg6[%c0_11, %c0_12], %14 {strides = array<i32>} : memref<8x128xf32, #tpu.memory_space<vmem>>, vector<8x128xf32>,
    return
  }
  func.func @transform_0(%arg0: i32) -> (i32, i32) {
    %c0_i32 = arith.constant 0 : i32
    %c0_i32_0 = arith.constant 0 : i32
    return %arg0, %c0_i32 : i32, i32
  }
  func.func @transform_1(%arg0: i32) -> (i32, i32) {
    %c0_i32 = arith.constant 0 : i32
    %c0_i32_0 = arith.constant 0 : i32
    %c0_i32_1 = arith.constant 0 : i32
    return %c0_i32, %c0_i32_0 : i32, i32
  }
  func.func @transform_2(%arg0: i32) -> (i32, i32) {
    %c0_i32 = arith.constant 0 : i32
    %c0_i32_0 = arith.constant 0 : i32
    %c0_i32_1 = arith.constant 0 : i32
    return %c0_i32, %c0_i32_0 : i32, i32
  }
  func.func @transform_3(%arg0: i32) -> (i32, i32) {
    %c0_i32 = arith.constant 0 : i32
    %c0_i32_0 = arith.constant 0 : i32
    %c0_i32_1 = arith.constant 0 : i32
    return %c0_i32, %c0_i32_0 : i32, i32
  }
  func.func @transform_4(%arg0: i32) -> (i32, i32) {
    %c0_i32 = arith.constant 0 : i32
    %c0_i32_0 = arith.constant 0 : i32
    %c0_i32_1 = arith.constant 0 : i32
    return %c0_i32, %c0_i32_0 : i32, i32
  }
  func.func @transform_5(%arg0: i32) -> (i32, i32) {
    %c0_i32 = arith.constant 0 : i32
    %c0_i32_0 = arith.constant 0 : i32
    return %arg0, %c0_i32 : i32, i32
  }
}

module attributes {stable_mosaic.version = 11 : i64} {
  func.func @two_layer_fc_kernel(%arg0: i32, %arg1: memref<8x1024xf32, #tpu.memory_space<vmem>>, %arg2: memref<1024x128xbf16, #tpu.memory_space<vmem>>, %arg3: memref<1x128xf32, #tpu.memory_space<vmem>>, %arg4: memref<128x128xbf16, #tpu.memory_space<vmem>>, %arg5: memref<1x128xf32, #tpu.memory_space<vmem>>, %arg6: memref<8x128xf32, #tpu.memory_space<vmem>>) attributes {dimension_semantics = [#tpu.dimension_semantics<parallel>], iteration_bounds = array<i64: 1>, scalar_prefetch = 0 : i64, scratch_operands = 0 : i64, tpu.core_type = #tpu.core_type<tc>, window_params = [{transform_indices = @transform_0, window_bounds = array<i64: 8, 1024>}, {pipeline_mode = #tpu.pipeline_mode<synchronous>, transform_indices = @transform_1, window_bounds = array<i64: 1024, 128>}, {pipeline_mode = #tpu.pipeline_mode<synchronous>, transform_indices = @transform_2, window_bounds = array<i64: 1, 128>}, {pipeline_mode = #tpu.pipeline_mode<synchronous>, transform_indices = @transform_3, window_bounds = array<i64: 128, 128>}, {pipeline_mode = #tpu.pipeline_mode<synchronous>, transform_indices = @transform_4, window_bounds = array<i64: 1, 128>}, {transform_indices = @transform_5, window_bounds = array<i64: 8, 128>}]} {
    %c0 = arith.constant 0 : index
    %c0_0 = arith.constant 0 : index
    %0 = vector.load %arg1[%c0, %c0_0] : memref<8x1024xf32, #tpu.memory_space<vmem>>, vector<8x1024xf32>
    %1 = arith.truncf %0 : vector<8x1024xf32> to vector<8x1024xbf16>
    %c0_1 = arith.constant 0 : index
    %c0_2 = arith.constant 0 : index
    %2 = vector.load %arg2[%c0_1, %c0_2] : memref<1024x128xbf16, #tpu.memory_space<vmem>>, vector<1024x128xbf16>
    %cst = arith.constant dense<0.000000e+00> : vector<8x128xf32>
    %3 = tpu.matmul %1, %2, %cst {dimension_numbers = #tpu.dot_dimension_numbers<[1], [0], [0], [1], [0, 0, 1, 1], [], []>} : vector<8x1024xbf16>, vector<1024x128xbf16>, vector<8x128xf32> -> vector<8x128xf32>
    %c0_3 = arith.constant 0 : index
    %c0_4 = arith.constant 0 : index
    %4 = vector.load %arg3[%c0_3, %c0_4] : memref<1x128xf32, #tpu.memory_space<vmem>>, vector<1x128xf32>
    %5 = vector.broadcast %4 : vector<1x128xf32> to vector<8x128xf32>
    %6 = arith.addf %3, %5 : vector<8x128xf32>
    %cst_5 = arith.constant 0.000000e+00 : f32
    %7 = vector.broadcast %cst_5 : f32 to vector<8x128xf32>
    %8 = arith.maximumf %6, %7 : vector<8x128xf32>
    %9 = arith.truncf %8 : vector<8x128xf32> to vector<8x128xbf16>
    %c0_6 = arith.constant 0 : index
    %c0_7 = arith.constant 0 : index
    %10 = vector.load %arg4[%c0_6, %c0_7] : memref<128x128xbf16, #tpu.memory_space<vmem>>, vector<128x128xbf16>
    %cst_8 = arith.constant dense<0.000000e+00> : vector<8x128xf32>
    %11 = tpu.matmul %9, %10, %cst_8 {dimension_numbers = #tpu.dot_dimension_numbers<[1], [0], [0], [1], [0, 0, 1, 1], [], []>} : vector<8x128xbf16>, vector<128x128xbf16>, vector<8x128xf32> -> vector<8x128xf32>
    %c0_9 = arith.constant 0 : index
    %c0_10 = arith.constant 0 : index
    %12 = vector.load %arg5[%c0_9, %c0_10] : memref<1x128xf32, #tpu.memory_space<vmem>>, vector<1x128xf32>
    %13 = vector.broadcast %12 : vector<1x128xf32> to vector<8x128xf32>
    %14 = arith.addf %11, %13 : vector<8x128xf32>
    %c0_11 = arith.constant 0 : index
    %c0_12 = arith.constant 0 : index
    %15 = vector.load %arg6[%c0_11, %c0_12] : memref<8x128xf32, #tpu.memory_space<vmem>>, vector<8x128xf32>
    tpu.vector_store %arg6[%c0_11, %c0_12], %14 {strides = array<i32>} : memref<8x128xf32, #tpu.memory_space<vmem>>, vector<8x128xf32>,
    return
  }
  func.func @transform_0(%arg0: i32) -> (i32, i32) {
    %c0_i32 = arith.constant 0 : i32
    %c0_i32_0 = arith.constant 0 : i32
    return %arg0, %c0_i32 : i32, i32
  }
  func.func @transform_1(%arg0: i32) -> (i32, i32) {
    %c0_i32 = arith.constant 0 : i32
    %c0_i32_0 = arith.constant 0 : i32
    %c0_i32_1 = arith.constant 0 : i32
    return %c0_i32, %c0_i32_0 : i32, i32
  }
  func.func @transform_2(%arg0: i32) -> (i32, i32) {
    %c0_i32 = arith.constant 0 : i32
    %c0_i32_0 = arith.constant 0 : i32
    %c0_i32_1 = arith.constant 0 : i32
    return %c0_i32, %c0_i32_0 : i32, i32
  }
  func.func @transform_3(%arg0: i32) -> (i32, i32) {
    %c0_i32 = arith.constant 0 : i32
    %c0_i32_0 = arith.constant 0 : i32
    %c0_i32_1 = arith.constant 0 : i32
    return %c0_i32, %c0_i32_0 : i32, i32
  }
  func.func @transform_4(%arg0: i32) -> (i32, i32) {
    %c0_i32 = arith.constant 0 : i32
    %c0_i32_0 = arith.constant 0 : i32
    %c0_i32_1 = arith.constant 0 : i32
    return %c0_i32, %c0_i32_0 : i32, i32
  }
  func.func @transform_5(%arg0: i32) -> (i32, i32) {
    %c0_i32 = arith.constant 0 : i32
    %c0_i32_0 = arith.constant 0 : i32
    return %arg0, %c0_i32 : i32, i32
  }
}

</mosaic_0001>

<bundles_post_ra>
// kernel: tpu_custom_call.1
= control target key start
LH: loop header
LB: loop body
LE: loop exit
PB: predicated region body
PF: predicated region fallthrough
CT: control target
= control target key end

     0   :  { %10 = vsyncpa [#allocation3], 0  ;;  %s1429_s0 = inlined_call_operand.hbm [shape: f32[2,1024], index: 0, kind: input, shape index: {}]   ;;  %s1430_s1 = inlined_call_operand.hbm [shape: bf16[1024,128], index: 1, kind: input, shape index: {}]   ;;  %s1431_s2 = inlined_call_operand.vmem [shape: f32[1,128], index: 2, kind: input, shape index: {}]   ;;  %s1432_s3 = inlined_call_operand.hbm [shape: bf16[128,128], index: 3, kind: input, shape index: {}]   ;;  %s1433_s4 = inlined_call_operand.vmem [shape: f32[1,128], index: 4, kind: input, shape index: {}]   ;;  %s1434_s5 = inlined_call_operand.hbm [shape: f32[2,128], index: 5, kind: output, shape index: {}]  }
   0x1   :  { %11 = vsyncpa [#allocation6], 0 }
   0x2   :  { %12 = vsyncpa [#allocation4], 0 }
   0x3   :  { %17 = vsyncadd [#allocation3], 768  ;;  %s1352_s18 = smov [#allocation5]  }
   0x4   :  { %s30_s19 = sshll.u32 %s1352_s18, 4  ;;  %s31_s19 = int_to_ptr.vmem [resolvable:$true] %s30_s19 }
   0x5   :  { %s1274_s20 = scalar_lea.vmem %s31_s19, 8192  ;;  %p1279_p1 = scmp.lt.s32.totalorder %s31_s19, %s31_s19 }
   0x6   :  { %p1275_p0 = scmp.ne.s32.totalorder %s31_s19, %s1274_s20  ;;  %p1280_p2 = scmp.lt.s32.totalorder %s1274_s20, %s1274_s20 }
   0x8   :  { %p1281_p3 = por %p1280_p2, %p1279_p1 }
   0xa   :  { %p1282_p4 = pnand %p1281_p3, %p1275_p0 }
   0xc   :  { %1285 = shalt.err (!%p1282_p4)
}
   0xd   :  { %s1353_s21 = smov 64   ;;  %s1354_s22 = smov 4  }
   0xe   :  { %36 = dma.hbm_to_vmem [thread:$0]  %s1430_s1, 8192, %s31_s19, [#allocation6], %s1353_s21, %s1353_s21, %s1354_s22  }
   0xf   :  { %s1355_s25 = smov [#allocation2]  }
  0x10   :  { %s18_s26 = sshll.u32 %s1355_s25, 4  ;;  %s19_s26 = int_to_ptr.vmem [resolvable:$true] %s18_s26 }
  0x11   :  { %s1294_s27 = scalar_lea.vmem %s19_s26, 256  ;;  %s1298_s28 = scalar_lea.vmem %s19_s26, 1024 }
  0x12   :  { %p1295_p5 = scmp.ne.s32.totalorder %s19_s26, %s1294_s27  ;;  %p1299_p6 = scmp.lt.s32.totalorder %s19_s26, %s19_s26 }
  0x13   :  { %p1300_p7 = scmp.lt.s32.totalorder %s1298_s28, %s1294_s27 }
  0x15   :  { %p1301_p8 = por %p1300_p7, %p1299_p6 }
  0x17   :  { %p1302_p9 = pnand %p1301_p8, %p1295_p5 }
  0x19   :  { %1305 = shalt.err (!%p1302_p9)
}
  0x1a   :  { %s1356_s29 = smov 256   ;;  %s1357_s30 = smov 16  }
  0x1b   :  { %24 = dma.hbm_to_vmem [thread:$0]  %s1429_s0, 256, %s19_s26, [#allocation3], %s1356_s29, %s1356_s29, %s1357_s30  }
  0x1c   :  { %s1358_s8 = smov [#allocation7]  }
  0x1d   :  { %s44_s9 = sshll.u32 %s1358_s8, 4  ;;  %s45_s9 = int_to_ptr.vmem [resolvable:$true] %s44_s9 }
  0x1e   :  { %s1314_s1 = scalar_lea.vmem %s45_s9, 1024  ;;  %p1319_p11 = scmp.lt.s32.totalorder %s45_s9, %s45_s9 }
  0x1f   :  { %p1315_p10 = scmp.ne.s32.totalorder %s45_s9, %s1314_s1  ;;  %p1320_p12 = scmp.lt.s32.totalorder %s1314_s1, %s1314_s1 }
  0x21   :  { %p1321_p13 = por %p1320_p12, %p1319_p11 }
  0x23   :  { %p1322_p0 = pnand %p1321_p13, %p1315_p10 }
  0x25   :  { %1325 = shalt.err (!%p1322_p0)
}
  0x26   :  { %50 = dma.hbm_to_vmem [thread:$0]  %s1432_s3, 1024, %s45_s9, [#allocation6], %s1353_s21, %s1353_s21, %s1354_s22  }
  0x27   :  { %1346 = dma.done.wait [#allocation3], 1024  }
  0x28   :  { %1347 = vsyncadd [#allocation3], 4294966272 }
  0x29   :  { %1348 = dma.done.wait [#allocation6], 9216  }
  0x2a   :  { %1349 = vsyncadd [#allocation6], 4294958080  ;;  %v1182_v0 = vld [vmem:[#allocation5 + $0x78] sm:$0xff]   ;;  %v1186_v4 = vld [vmem:[#allocation5 + $0x70] sm:$0xff]   ;;  %v1359_v24 = vmov 1983009808   ;;  %v86_v26 = vlaneseq }
  0x2b   :  { %v1183_v1 = vld [vmem:[#allocation5 + $0xf8] sm:$0xff]   ;;  %1052 = vmatprep.subr.bf16.mxu0 %v1182_v0  ;;  %v1187_v5 = vld [vmem:[#allocation5 + $0xf0] sm:$0xff]   ;;  %v1190_v8 = vld [vmem:[#allocation5 + $0x68] sm:$0xff]   ;;  %v84_v25 = vunpack.c.l.s4 %v1359_v24  ;;  %vm1361_vm0 = vmmov 0  }
  0x2c   :  { %v1184_v2 = vld [vmem:[#allocation5 + $0x38] sm:$0xff]   ;;  %1074 = vmatprep.subr.bf16.mxu1 %v1183_v1  ;;  %v1188_v6 = vld [vmem:[#allocation5 + $0x30] sm:$0xff]   ;;  %v1191_v9 = vld [vmem:[#allocation5 + $0xe8] sm:$0xff]   ;;  %v87_v32 = vshrl.u32 %v86_v26, 7 }
  0x2d   :  { %v1185_v3 = vld [vmem:[#allocation5 + $0xb8] sm:$0xff]   ;;  %1053 = vmatpush3.bf16.msra.mxu0 %v1184_v2  ;;  %v1189_v7 = vld [vmem:[#allocation5 + $0xb0] sm:$0xff]   ;;  %v1192_v10 = vld [vmem:[#allocation5 + $0x28] sm:$0xff]   ;;  %v85_v31 = vunpack.c.0.s8 %v84_v25 }
  0x2e   :  { %1075 = vmatpush3.bf16.msra.mxu1 %v1185_v3  ;;  %1054 = vmatprep.subr.bf16.mxu0 %v1186_v4  ;;  %v1193_v11 = vld [vmem:[#allocation5 + $0xa8] sm:$0xff]   ;;  %v1194_v12 = vld [vmem:[#allocation5 + $0x60] sm:$0xff]   ;;  %v1198_v16 = vld [vmem:[#allocation5 + $0x58] sm:$0xff]  }
  0x2f   :  { %1076 = vmatprep.subr.bf16.mxu1 %v1187_v5  ;;  %v1195_v13 = vld [vmem:[#allocation5 + $0xe0] sm:$0xff]   ;;  %v1199_v17 = vld [vmem:[#allocation5 + $0xd8] sm:$0xff]   ;;  %v1202_v20 = vld [vmem:[#allocation5 + $0x50] sm:$0xff]   ;;  %v1410_v37 = vsub.s32 %v85_v31, %v87_v32 }
  0x30   :  { %v1196_v14 = vld [vmem:[#allocation5 + $0x20] sm:$0xff]   ;;  %v1200_v18 = vld [vmem:[#allocation5 + $0x18] sm:$0xff]   ;;  %v1203_v21 = vld [vmem:[#allocation5 + $0xd0] sm:$0xff]  }
  0x31   :  { %1055 = vmatpush3.bf16.msra.mxu0 %v1188_v6  ;;  %v1197_v15 = vld [vmem:[#allocation5 + $0xa0] sm:$0xff]   ;;  %v1201_v19 = vld [vmem:[#allocation5 + $0x98] sm:$0xff]   ;;  %v1204_v22 = vld [vmem:[#allocation5 + $0x10] sm:$0xff]  }
  0x32   :  { %1077 = vmatpush3.bf16.msra.mxu1 %v1189_v7  ;;  %1056 = vmatprep.subr.bf16.mxu0 %v1190_v8  ;;  %v1205_v23 = vld [vmem:[#allocation5 + $0x90] sm:$0xff]   ;;  %v1206_v27 = vld [vmem:[#allocation5 + $0x48] sm:$0xff]   ;;  %v1210_v33 = vld [vmem:[#allocation5 + $0x40] sm:$0xff]  }
  0x33   :  { %1078 = vmatprep.subr.bf16.mxu1 %v1191_v9  ;;  %v1207_v28 = vld [vmem:[#allocation5 + $0xc8] sm:$0xff]   ;;  %v1211_v34 = vld [vmem:[#allocation5 + $0xc0] sm:$0xff]   ;;  %v1220_v44 = vld [vmem:[#allocation5 + $0x178] sm:$0xff]  }
  0x34   :  { %v1208_v29 = vld [vmem:[#allocation5 + $0x8] sm:$0xff]   ;;  %v1212_v35 = vld [vmem:[#allocation5] sm:$0xff]   ;;  %v1221_v47 = vld [vmem:[#allocation5 + $0x1f8] sm:$0xff]  }
  0x35   :  { %1057 = vmatpush3.bf16.msra.mxu0 %v1192_v10  ;;  %v1209_v30 = vld [vmem:[#allocation5 + $0x88] sm:$0xff]   ;;  %v1213_v36 = vld [vmem:[#allocation5 + $0x80] sm:$0xff]   ;;  %v1222_v50 = vld [vmem:[#allocation5 + $0x138] sm:$0xff]  }
  0x36   :  { %1079 = vmatpush3.bf16.msra.mxu1 %v1193_v11  ;;  %1058 = vmatprep.subr.bf16.mxu0 %v1194_v12  ;;  %v1214_v38 = vld [vmem:[#allocation2] ss:$16 sps:$4 sm:$0xff]   ;;  %v1218_v40 = vld [vmem:[#allocation2 + $0x4] ss:$16 sps:$4 sm:$0xff]   ;;  %v1223_v53 = vld [vmem:[#allocation5 + $0x1b8] sm:$0xff]  }
  0x37   :  { %1080 = vmatprep.subr.bf16.mxu1 %v1195_v13  ;;  %v1216_v39 = vld [vmem:[#allocation2 + $0x20] ss:$16 sps:$4 sm:$0xff]   ;;  %v1219_v41 = vld [vmem:[#allocation2 + $0x24] ss:$16 sps:$4 sm:$0xff]   ;;  %v89_v42 = vrot.slane %v1214_v38, %v1410_v37  ;;  %v96_v45 = vrot.slane %v1218_v40, %v1410_v37  ;;  %v1228_v62 = vld [vmem:[#allocation5 + $0x168] sm:$0xff]   ;;  %v1360_v40 = vmov 0.0  }
  0x38   :  { %v103_v43 = vrot.slane %v1216_v39, %v1410_v37  ;;  %v110_v46 = vrot.slane %v1219_v41, %v1410_v37  ;;  %v1224_v56 = vld [vmem:[#allocation5 + $0x170] sm:$0xff]   ;;  %v1229_v63 = vld [vmem:[#allocation5 + $0x1e8] sm:$0xff]   ;;  %v1232_v2 = vld [vmem:[#allocation5 + $0x160] sm:$0xff]  }
  0x39   :  { %1059 = vmatpush3.bf16.msra.mxu0 %v1196_v14  ;;  %v1225_v59 = vld [vmem:[#allocation5 + $0x1f0] sm:$0xff]   ;;  %v1230_v0 = vld [vmem:[#allocation5 + $0x128] sm:$0xff]   ;;  %v1233_v3 = vld [vmem:[#allocation5 + $0x1e0] sm:$0xff]  }
  0x3a   :  { %1081 = vmatpush3.bf16.msra.mxu1 %v1197_v15  ;;  %1060 = vmatprep.subr.bf16.mxu0 %v1198_v16  ;;  %v112_v48 = vcombine.high %v89_v42, %v103_v43  ;;  %v111_v49 = vcombine.low %v89_v42, %v103_v43  ;;  %v114_v51 = vcombine.high %v96_v45, %v110_v46  ;;  %v1226_v60 = vld [vmem:[#allocation5 + $0x130] sm:$0xff]   ;;  %v1231_v1 = vld [vmem:[#allocation5 + $0x1a8] sm:$0xff]   ;;  %v1234_v4 = vld [vmem:[#allocation5 + $0x120] sm:$0xff]  }
  0x3b   :  { %1082 = vmatprep.subr.bf16.mxu1 %v1199_v17  ;;  %v113_v52 = vcombine.low %v96_v45, %v110_v46  ;;  %v1227_v61 = vld [vmem:[#allocation5 + $0x1b0] sm:$0xff]   ;;  %v1235_v5 = vld [vmem:[#allocation5 + $0x1a0] sm:$0xff]   ;;  %v1236_v6 = vld [vmem:[#allocation5 + $0x158] sm:$0xff]  }
  0x3c   :  { %v160_v54 = vpack.c.bf16 %v112_v48, %v112_v48  ;;  %v159_v55 = vpack.c.bf16 %v111_v49, %v111_v49  ;;  %v162_v57 = vpack.c.bf16 %v114_v51, %v114_v51  ;;  %v1237_v7 = vld [vmem:[#allocation5 + $0x1d8] sm:$0xff]   ;;  %v1240_v10 = vld [vmem:[#allocation5 + $0x150] sm:$0xff]   ;;  %v1244_v14 = vld [vmem:[#allocation5 + $0x148] sm:$0xff]  }
  0x3d   :  { %1061 = vmatpush3.bf16.msra.mxu0 %v1200_v18  ;;  %v161_v58 = vpack.c.bf16 %v113_v52, %v113_v52  ;;  %v1238_v8 = vld [vmem:[#allocation5 + $0x118] sm:$0xff]   ;;  %v1241_v11 = vld [vmem:[#allocation5 + $0x1d0] sm:$0xff]   ;;  %v1245_v15 = vld [vmem:[#allocation5 + $0x1c8] sm:$0xff]  }
  0x3e   :  { %1083 = vmatpush3.bf16.msra.mxu1 %v1201_v19  ;;  %1062 = vmatprep.subr.bf16.mxu0 %v1202_v20  ;;  %v1239_v9 = vld [vmem:[#allocation5 + $0x198] sm:$0xff]   ;;  %v1242_v12 = vld [vmem:[#allocation5 + $0x110] sm:$0xff]   ;;  %v1246_v16 = vld [vmem:[#allocation5 + $0x108] sm:$0xff]  }
  0x3f   :  { %1084 = vmatprep.subr.bf16.mxu1 %v1203_v21  ;;  %718 = vmatprep.mubr.bf16.mxu0 %v160_v54  ;;  %v1243_v13 = vld [vmem:[#allocation5 + $0x190] sm:$0xff]   ;;  %v1247_v17 = vld [vmem:[#allocation5 + $0x188] sm:$0xff]   ;;  %v1248_v18 = vld [vmem:[#allocation5 + $0x140] sm:$0xff]  }
  0x40   :  { %758 = vmatprep.mubr.bf16.mxu1 %v162_v57  ;;  %v1249_v19 = vld [vmem:[#allocation5 + $0x1c0] sm:$0xff]   ;;  %v1256_v24 = vld [vmem:[#allocation2 + $0xc] ss:$16 sps:$4 sm:$0xff]   ;;  %v1259_v41 = vld [vmem:[#allocation7 + $0x30] sm:$0xff]  }
  0x41   :  { %1063 = vmatpush3.bf16.msra.mxu0 %v1204_v22  ;;  %v1250_v20 = vld [vmem:[#allocation5 + $0x100] sm:$0xff]   ;;  %v1252_v22 = vld [vmem:[#allocation2 + $0x8] ss:$16 sps:$4 sm:$0xff]   ;;  %v1257_v25 = vld [vmem:[#allocation2 + $0x2c] ss:$16 sps:$4 sm:$0xff]  }
  0x42   :  { %1085 = vmatpush3.bf16.msra.mxu1 %v1205_v23  ;;  %1064 = vmatprep.subr.bf16.mxu0 %v1206_v27  ;;  %v1251_v21 = vld [vmem:[#allocation5 + $0x180] sm:$0xff]   ;;  %v1254_v23 = vld [vmem:[#allocation2 + $0x28] ss:$16 sps:$4 sm:$0xff]   ;;  %v125_v26 = vrot.slane %v1252_v22, %v1410_v37 }
  0x43   :  { %1086 = vmatprep.subr.bf16.mxu1 %v1207_v28  ;;  %v139_v27 = vrot.slane %v1254_v23, %v1410_v37  ;;  %v132_v28 = vrot.slane %v1256_v24, %v1410_v37  ;;  %v1258_v39 = vld [vmem:[#allocation7 + $0x38] sm:$0xff]   ;;  %v1261_v42 = vld [vmem:[#allocation7 + $0x20] sm:$0xff]   ;;  %v1264_v45 = vld [vmem:[#allocation7 + $0x8] sm:$0xff]  }
  0x44   :  { %v1262_v43 = vld [vmem:[#allocation7 + $0x18] sm:$0xff]   ;;  %v1265_v46 = vld [vmem:[#allocation7] sm:$0xff]  }
  0x45   :  { %1065 = vmatpush3.bf16.msra.mxu0 %v1208_v29  ;;  %v146_v29 = vrot.slane %v1257_v25, %v1410_v37  ;;  %v147_v31 = vcombine.low %v125_v26, %v139_v27  ;;  %v1260_v37 = vld [vmem:[#allocation7 + $0x28] sm:$0xff]  }
  0x46   :  { %1087 = vmatpush3.bf16.msra.mxu1 %v1209_v30  ;;  %1066 = vmatprep.subr.bf16.mxu0 %v1210_v33  ;;  %v148_v30 = vcombine.high %v125_v26, %v139_v27 }
  0x47   :  { %1088 = vmatprep.subr.bf16.mxu1 %v1211_v34  ;;  %v150_v32 = vcombine.high %v132_v28, %v146_v29  ;;  %v149_v33 = vcombine.low %v132_v28, %v146_v29 }
  0x48   :  { %v164_v34 = vpack.c.bf16 %v148_v30, %v148_v30 }
  0x49   :  { %1067 = vmatpush3.bf16.msra.mxu0 %v1212_v35  ;;  %v163_v35 = vpack.c.bf16 %v147_v31, %v147_v31  ;;  %v165_v38 = vpack.c.bf16 %v149_v33, %v149_v33 }
  0x4a   :  { %1089 = vmatpush3.bf16.msra.mxu1 %v1213_v36  ;;  %1096 = vmatprep.subr.bf16.mxu0 %v1220_v44  ;;  %v166_v36 = vpack.c.bf16 %v150_v32, %v150_v32  ;;  %v1263_v44 = vld [vmem:[#allocation7 + $0x10] sm:$0xff]  }
  0x4b   :  { %1118 = vmatprep.subr.bf16.mxu1 %v1221_v47 }
  0x4c   :  { %719 = vmatmul.mubr.bf16.vlgmr.msra.gmra.mxu0 %v159_v55 }
  0x4d   :  { %759 = vmatmul.mubr.bf16.vlgmr.msra.gmra.mxu1 %v161_v58  ;;  %1097 = vmatpush3.bf16.msra.mxu0 %v1222_v50 }
  0x4e   :  { %1119 = vmatpush3.bf16.msra.mxu1 %v1223_v53  ;;  %1098 = vmatprep.subr.bf16.mxu0 %v1224_v56  ;;  %v978_v56 = vld [vmem:[%s1431_s2] ss:$0 sm:$0xff] }
  0x4f   :  { %1120 = vmatprep.subr.bf16.mxu1 %v1225_v59  ;;  %798 = vmatprep.mubr.bf16.mxu0 %v164_v34 }
  0x50   :  { %838 = vmatprep.mubr.bf16.mxu1 %v166_v36 }
  0x51   :  { %1099 = vmatpush3.bf16.msra.mxu0 %v1226_v60 }
  0x52   :  { %1121 = vmatpush3.bf16.msra.mxu1 %v1227_v61  ;;  %1100 = vmatprep.subr.bf16.mxu0 %v1228_v62 }
  0x53   :  { %1122 = vmatprep.subr.bf16.mxu1 %v1229_v63 }
  0x55   :  { %1101 = vmatpush3.bf16.msra.mxu0 %v1230_v0 }
  0x56   :  { %1123 = vmatpush3.bf16.msra.mxu1 %v1231_v1  ;;  %1102 = vmatprep.subr.bf16.mxu0 %v1232_v2 }
  0x57   :  { %1124 = vmatprep.subr.bf16.mxu1 %v1233_v3 }
  0x59   :  { %1103 = vmatpush3.bf16.msra.mxu0 %v1234_v4 }
  0x5a   :  { %1125 = vmatpush3.bf16.msra.mxu1 %v1235_v5  ;;  %1104 = vmatprep.subr.bf16.mxu0 %v1236_v6 }
  0x5b   :  { %1126 = vmatprep.subr.bf16.mxu1 %v1237_v7 }
  0x5d   :  { %1105 = vmatpush3.bf16.msra.mxu0 %v1238_v8 }
  0x5e   :  { %1127 = vmatpush3.bf16.msra.mxu1 %v1239_v9  ;;  %1106 = vmatprep.subr.bf16.mxu0 %v1240_v10  ;;  %v1043_v10 = vld [vmem:[%s1433_s4] ss:$0 sm:$0xff] }
  0x5f   :  { %1128 = vmatprep.subr.bf16.mxu1 %v1241_v11 }
  0x61   :  { %1107 = vmatpush3.bf16.msra.mxu0 %v1242_v12 }
  0x62   :  { %1129 = vmatpush3.bf16.msra.mxu1 %v1243_v13  ;;  %1108 = vmatprep.subr.bf16.mxu0 %v1244_v14 }
  0x63   :  { %1130 = vmatprep.subr.bf16.mxu1 %v1245_v15 }
  0x65   :  { %1109 = vmatpush3.bf16.msra.mxu0 %v1246_v16 }
  0x66   :  { %1131 = vmatpush3.bf16.msra.mxu1 %v1247_v17  ;;  %1110 = vmatprep.subr.bf16.mxu0 %v1248_v18 }
  0x67   :  { %1132 = vmatprep.subr.bf16.mxu1 %v1249_v19 }
  0x69   :  { %1111 = vmatpush3.bf16.msra.mxu0 %v1250_v20 }
  0x6a   :  { %1133 = vmatpush3.bf16.msra.mxu1 %v1251_v21  ;;  %1149 = vmatprep.subr.bf16.mxu0 %v1360_v40 }
  0x6c   :  { %799 = vmatmul.mubr.bf16.vlgmr.msra.gmra.mxu0 %v163_v35 }
  0x6d   :  { %839 = vmatmul.mubr.bf16.vlgmr.msra.gmra.mxu1 %v165_v38  ;;  %1150 = vmatpush3.bf16.msra.mxu0 %v1258_v39 }
  0x6e   :  { %1151 = vmatprep.subr.bf16.mxu0 %v1360_v40  ;;  %1165 = vmatprep.mubr.msk.bf16.mxu0 %vm1361_vm0, %v1360_v40 }
  0x71   :  { %1152 = vmatpush3.bf16.msra.mxu0 %v1259_v41 }
  0x72   :  { %1153 = vmatprep.subr.bf16.mxu0 %v1360_v40 }
  0x75   :  { %1154 = vmatpush3.bf16.msra.mxu0 %v1260_v37 }
  0x76   :  { %1155 = vmatprep.subr.bf16.mxu0 %v1360_v40 }
  0x79   :  { %1156 = vmatpush3.bf16.msra.mxu0 %v1261_v42 }
  0x7a   :  { %1157 = vmatprep.subr.bf16.mxu0 %v1360_v40 }
  0x7d   :  { %1158 = vmatpush3.bf16.msra.mxu0 %v1262_v43 }
  0x7e   :  { %1159 = vmatprep.subr.bf16.mxu0 %v1360_v40 }
  0x81   :  { %1160 = vmatpush3.bf16.msra.mxu0 %v1263_v44 }
  0x82   :  { %1161 = vmatprep.subr.bf16.mxu0 %v1360_v40 }
  0x85   :  { %1162 = vmatpush3.bf16.msra.mxu0 %v1264_v45 }
  0x86   :  { %1163 = vmatprep.subr.bf16.mxu0 %v1360_v40 }
  0x89   :  { %1164 = vmatpush3.bf16.msra.mxu0 %v1265_v46 }
 0x10c   :  { %v1068_v47 = vpop.f32.mrf.mxu0 }
 0x10d   :  { %v1090_v48 = vpop.f32.mrf.mxu1 }
 0x10e   :  { %v1069_v49 = vpop.f32.mrf.mxu0 }
 0x10f   :  { %v1091_v50 = vpop.f32.mrf.mxu1  ;;  %v1070_v55 = vadd.f32 %v1069_v49, %v1068_v47 }
 0x110   :  { %v1071_v51 = vpop.f32.mrf.mxu0  ;;  %v1092_v58 = vadd.f32 %v1091_v50, %v1090_v48 }
 0x111   :  { %v1093_v52 = vpop.f32.mrf.mxu1  ;;  %v721_v57 = vadd.f32 %v1070_v55, %v978_v56 }
 0x112   :  { %v1072_v53 = vpop.f32.mrf.mxu0 }
 0x113   :  { %v1094_v54 = vpop.f32.mrf.mxu1  ;;  %v761_v62 = vadd.f32 %v1092_v58, %v721_v57 }
 0x12c   :  { %v1112_v59 = vpop.f32.mrf.mxu0 }
 0x12d   :  { %v1134_v60 = vpop.f32.mrf.mxu1 }
 0x12e   :  { %v1113_v61 = vpop.f32.mrf.mxu0 }
 0x12f   :  { %v1114_v63 = vadd.f32 %v1113_v61, %v1112_v59  ;;  %v1135_v0 = vpop.f32.mrf.mxu1 }
 0x130   :  { %v1115_v1 = vpop.f32.mrf.mxu0  ;;  %v1136_v3 = vadd.f32 %v1135_v0, %v1134_v60 }
 0x131   :  { %v801_v2 = vadd.f32 %v1114_v63, %v761_v62  ;;  %v1137_v4 = vpop.f32.mrf.mxu1 }
 0x132   :  { %v1116_v5 = vpop.f32.mrf.mxu0 }
 0x133   :  { %v841_v6 = vadd.f32 %v1136_v3, %v801_v2  ;;  %v1138_v7 = vpop.f32.mrf.mxu1 }
 0x135   :  { %v846_v8 = vmax.f32 %v841_v6, 0.0 }
 0x137   :  { %v847_v9 = vpack.c.bf16 %v846_v8, %v846_v8 }
 0x139   :  { %1166 = vmatmul.mubr.bf16.vlgmr.msra.gmra.mxu0 %v847_v9 }
 0x1f9   :  { %v953_v11 = vpop.f32.mrf.mxu0 }
 0x1fa   :  { %v954_v12 = vadd.f32 %v1043_v10, %v953_v11 }
 0x1fb   :  { %v1167_v13 = vpop.f32.mrf.mxu0 }
 0x1fc   :  { %959 = vst [vmem:[#allocation8] sm:$0xff] %v954_v12 }
 0x1fd   :  { %v956_v14 = vpop.f32.mrf.mxu0 }
 0x1ff   :  { %v1168_v15 = vpop.f32.mrf.mxu0 }
 0x200   :  { %964 = vsyncadd [#allocation4], 96  ;;  %s1362_s13 = smov [#allocation8]  }
 0x201   :  { %s965_s14 = sshll.u32 %s1362_s13, 4  ;;  %s966_s14 = int_to_ptr.vmem [resolvable:$true] %s965_s14 }
 0x202   :  { %s1326_s15 = scalar_lea.vmem %s966_s14, 32  ;;  %s1330_s16 = scalar_lea.vmem %s966_s14, 128 }
 0x203   :  { %p1327_p1 = scmp.ne.s32.totalorder %s966_s14, %s1326_s15  ;;  %p1331_p2 = scmp.lt.s32.totalorder %s966_s14, %s966_s14 }
 0x204   :  { %p1332_p3 = scmp.lt.s32.totalorder %s1330_s16, %s1326_s15 }
 0x206   :  { %p1333_p4 = por %p1332_p3, %p1331_p2 }
 0x208   :  { %p1334_p5 = pnand %p1333_p4, %p1327_p1 }
 0x20a   :  { %1337 = shalt.err (!%p1334_p5)
}
 0x20b   :  { %s1363_s17 = smov 32   ;;  %s1364_s4 = smov 2  }
 0x20c   :  { %971 = dma.vmem_to_hbm [thread:$0]  %s966_s14, 32, %s1434_s5, [#allocation4], %s1363_s17, %s1363_s17, %s1364_s4  }
 0x20d   :  { %1350 = dma.done.wait [#allocation4], 128  }
 0x20e   :  { %1351 = vsyncadd [#allocation4], 4294967168 }
 0x20f   :  { %975 = vsyncpa [#allocation3], 1 }
 0x210   :  { %976 = vsyncpa [#allocation6], 1 }
 0x211   :  { %977 = vsyncpa [#allocation4], 1 }

// kernel: tpu_custom_call.1
= control target key start
LH: loop header
LB: loop body
LE: loop exit
PB: predicated region body
PF: predicated region fallthrough
CT: control target
= control target key end

     0   :  { %10 = vsyncpa [#allocation3], 0  ;;  %s1429_s0 = inlined_call_operand.hbm [shape: f32[2,1024], index: 0, kind: input, shape index: {}]   ;;  %s1430_s1 = inlined_call_operand.hbm [shape: bf16[1024,128], index: 1, kind: input, shape index: {}]   ;;  %s1431_s2 = inlined_call_operand.vmem [shape: f32[1,128], index: 2, kind: input, shape index: {}]   ;;  %s1432_s3 = inlined_call_operand.hbm [shape: bf16[128,128], index: 3, kind: input, shape index: {}]   ;;  %s1433_s4 = inlined_call_operand.vmem [shape: f32[1,128], index: 4, kind: input, shape index: {}]   ;;  %s1434_s5 = inlined_call_operand.hbm [shape: f32[2,128], index: 5, kind: output, shape index: {}]  }
   0x1   :  { %11 = vsyncpa [#allocation6], 0 }
   0x2   :  { %12 = vsyncpa [#allocation4], 0 }
   0x3   :  { %17 = vsyncadd [#allocation3], 768  ;;  %s1352_s18 = smov [#allocation5]  }
   0x4   :  { %s30_s19 = sshll.u32 %s1352_s18, 4  ;;  %s31_s19 = int_to_ptr.vmem [resolvable:$true] %s30_s19 }
   0x5   :  { %s1274_s20 = scalar_lea.vmem %s31_s19, 8192  ;;  %p1279_p1 = scmp.lt.s32.totalorder %s31_s19, %s31_s19 }
   0x6   :  { %p1275_p0 = scmp.ne.s32.totalorder %s31_s19, %s1274_s20  ;;  %p1280_p2 = scmp.lt.s32.totalorder %s1274_s20, %s1274_s20 }
   0x8   :  { %p1281_p3 = por %p1280_p2, %p1279_p1 }
   0xa   :  { %p1282_p4 = pnand %p1281_p3, %p1275_p0 }
   0xc   :  { %1285 = shalt.err (!%p1282_p4)
}
   0xd   :  { %s1353_s21 = smov 64   ;;  %s1354_s22 = smov 4  }
   0xe   :  { %36 = dma.hbm_to_vmem [thread:$0]  %s1430_s1, 8192, %s31_s19, [#allocation6], %s1353_s21, %s1353_s21, %s1354_s22  }
   0xf   :  { %s1355_s25 = smov [#allocation2]  }
  0x10   :  { %s18_s26 = sshll.u32 %s1355_s25, 4  ;;  %s19_s26 = int_to_ptr.vmem [resolvable:$true] %s18_s26 }
  0x11   :  { %s1294_s27 = scalar_lea.vmem %s19_s26, 256  ;;  %s1298_s28 = scalar_lea.vmem %s19_s26, 1024 }
  0x12   :  { %p1295_p5 = scmp.ne.s32.totalorder %s19_s26, %s1294_s27  ;;  %p1299_p6 = scmp.lt.s32.totalorder %s19_s26, %s19_s26 }
  0x13   :  { %p1300_p7 = scmp.lt.s32.totalorder %s1298_s28, %s1294_s27 }
  0x15   :  { %p1301_p8 = por %p1300_p7, %p1299_p6 }
  0x17   :  { %p1302_p9 = pnand %p1301_p8, %p1295_p5 }
  0x19   :  { %1305 = shalt.err (!%p1302_p9)
}
  0x1a   :  { %s1356_s29 = smov 256   ;;  %s1357_s30 = smov 16  }
  0x1b   :  { %24 = dma.hbm_to_vmem [thread:$0]  %s1429_s0, 256, %s19_s26, [#allocation3], %s1356_s29, %s1356_s29, %s1357_s30  }
  0x1c   :  { %s1358_s8 = smov [#allocation7]  }
  0x1d   :  { %s44_s9 = sshll.u32 %s1358_s8, 4  ;;  %s45_s9 = int_to_ptr.vmem [resolvable:$true] %s44_s9 }
  0x1e   :  { %s1314_s1 = scalar_lea.vmem %s45_s9, 1024  ;;  %p1319_p11 = scmp.lt.s32.totalorder %s45_s9, %s45_s9 }
  0x1f   :  { %p1315_p10 = scmp.ne.s32.totalorder %s45_s9, %s1314_s1  ;;  %p1320_p12 = scmp.lt.s32.totalorder %s1314_s1, %s1314_s1 }
  0x21   :  { %p1321_p13 = por %p1320_p12, %p1319_p11 }
  0x23   :  { %p1322_p0 = pnand %p1321_p13, %p1315_p10 }
  0x25   :  { %1325 = shalt.err (!%p1322_p0)
}
  0x26   :  { %50 = dma.hbm_to_vmem [thread:$0]  %s1432_s3, 1024, %s45_s9, [#allocation6], %s1353_s21, %s1353_s21, %s1354_s22  }
  0x27   :  { %1346 = dma.done.wait [#allocation3], 1024  }
  0x28   :  { %1347 = vsyncadd [#allocation3], 4294966272 }
  0x29   :  { %1348 = dma.done.wait [#allocation6], 9216  }
  0x2a   :  { %1349 = vsyncadd [#allocation6], 4294958080  ;;  %v1182_v0 = vld [vmem:[#allocation5 + $0x78] sm:$0xff]   ;;  %v1186_v4 = vld [vmem:[#allocation5 + $0x70] sm:$0xff]   ;;  %v1359_v24 = vmov 1983009808   ;;  %v86_v26 = vlaneseq }
  0x2b   :  { %v1183_v1 = vld [vmem:[#allocation5 + $0xf8] sm:$0xff]   ;;  %1052 = vmatprep.subr.bf16.mxu0 %v1182_v0  ;;  %v1187_v5 = vld [vmem:[#allocation5 + $0xf0] sm:$0xff]   ;;  %v1190_v8 = vld [vmem:[#allocation5 + $0x68] sm:$0xff]   ;;  %v84_v25 = vunpack.c.l.s4 %v1359_v24  ;;  %vm1361_vm0 = vmmov 0  }
  0x2c   :  { %v1184_v2 = vld [vmem:[#allocation5 + $0x38] sm:$0xff]   ;;  %1074 = vmatprep.subr.bf16.mxu1 %v1183_v1  ;;  %v1188_v6 = vld [vmem:[#allocation5 + $0x30] sm:$0xff]   ;;  %v1191_v9 = vld [vmem:[#allocation5 + $0xe8] sm:$0xff]   ;;  %v87_v32 = vshrl.u32 %v86_v26, 7 }
  0x2d   :  { %v1185_v3 = vld [vmem:[#allocation5 + $0xb8] sm:$0xff]   ;;  %1053 = vmatpush3.bf16.msra.mxu0 %v1184_v2  ;;  %v1189_v7 = vld [vmem:[#allocation5 + $0xb0] sm:$0xff]   ;;  %v1192_v10 = vld [vmem:[#allocation5 + $0x28] sm:$0xff]   ;;  %v85_v31 = vunpack.c.0.s8 %v84_v25 }
  0x2e   :  { %1075 = vmatpush3.bf16.msra.mxu1 %v1185_v3  ;;  %1054 = vmatprep.subr.bf16.mxu0 %v1186_v4  ;;  %v1193_v11 = vld [vmem:[#allocation5 + $0xa8] sm:$0xff]   ;;  %v1194_v12 = vld [vmem:[#allocation5 + $0x60] sm:$0xff]   ;;  %v1198_v16 = vld [vmem:[#allocation5 + $0x58] sm:$0xff]  }
  0x2f   :  { %1076 = vmatprep.subr.bf16.mxu1 %v1187_v5  ;;  %v1195_v13 = vld [vmem:[#allocation5 + $0xe0] sm:$0xff]   ;;  %v1199_v17 = vld [vmem:[#allocation5 + $0xd8] sm:$0xff]   ;;  %v1202_v20 = vld [vmem:[#allocation5 + $0x50] sm:$0xff]   ;;  %v1410_v37 = vsub.s32 %v85_v31, %v87_v32 }
  0x30   :  { %v1196_v14 = vld [vmem:[#allocation5 + $0x20] sm:$0xff]   ;;  %v1200_v18 = vld [vmem:[#allocation5 + $0x18] sm:$0xff]   ;;  %v1203_v21 = vld [vmem:[#allocation5 + $0xd0] sm:$0xff]  }
  0x31   :  { %1055 = vmatpush3.bf16.msra.mxu0 %v1188_v6  ;;  %v1197_v15 = vld [vmem:[#allocation5 + $0xa0] sm:$0xff]   ;;  %v1201_v19 = vld [vmem:[#allocation5 + $0x98] sm:$0xff]   ;;  %v1204_v22 = vld [vmem:[#allocation5 + $0x10] sm:$0xff]  }
  0x32   :  { %1077 = vmatpush3.bf16.msra.mxu1 %v1189_v7  ;;  %1056 = vmatprep.subr.bf16.mxu0 %v1190_v8  ;;  %v1205_v23 = vld [vmem:[#allocation5 + $0x90] sm:$0xff]   ;;  %v1206_v27 = vld [vmem:[#allocation5 + $0x48] sm:$0xff]   ;;  %v1210_v33 = vld [vmem:[#allocation5 + $0x40] sm:$0xff]  }
  0x33   :  { %1078 = vmatprep.subr.bf16.mxu1 %v1191_v9  ;;  %v1207_v28 = vld [vmem:[#allocation5 + $0xc8] sm:$0xff]   ;;  %v1211_v34 = vld [vmem:[#allocation5 + $0xc0] sm:$0xff]   ;;  %v1220_v44 = vld [vmem:[#allocation5 + $0x178] sm:$0xff]  }
  0x34   :  { %v1208_v29 = vld [vmem:[#allocation5 + $0x8] sm:$0xff]   ;;  %v1212_v35 = vld [vmem:[#allocation5] sm:$0xff]   ;;  %v1221_v47 = vld [vmem:[#allocation5 + $0x1f8] sm:$0xff]  }
  0x35   :  { %1057 = vmatpush3.bf16.msra.mxu0 %v1192_v10  ;;  %v1209_v30 = vld [vmem:[#allocation5 + $0x88] sm:$0xff]   ;;  %v1213_v36 = vld [vmem:[#allocation5 + $0x80] sm:$0xff]   ;;  %v1222_v50 = vld [vmem:[#allocation5 + $0x138] sm:$0xff]  }
  0x36   :  { %1079 = vmatpush3.bf16.msra.mxu1 %v1193_v11  ;;  %1058 = vmatprep.subr.bf16.mxu0 %v1194_v12  ;;  %v1214_v38 = vld [vmem:[#allocation2] ss:$16 sps:$4 sm:$0xff]   ;;  %v1218_v40 = vld [vmem:[#allocation2 + $0x4] ss:$16 sps:$4 sm:$0xff]   ;;  %v1223_v53 = vld [vmem:[#allocation5 + $0x1b8] sm:$0xff]  }
  0x37   :  { %1080 = vmatprep.subr.bf16.mxu1 %v1195_v13  ;;  %v1216_v39 = vld [vmem:[#allocation2 + $0x20] ss:$16 sps:$4 sm:$0xff]   ;;  %v1219_v41 = vld [vmem:[#allocation2 + $0x24] ss:$16 sps:$4 sm:$0xff]   ;;  %v89_v42 = vrot.slane %v1214_v38, %v1410_v37  ;;  %v96_v45 = vrot.slane %v1218_v40, %v1410_v37  ;;  %v1228_v62 = vld [vmem:[#allocation5 + $0x168] sm:$0xff]   ;;  %v1360_v40 = vmov 0.0  }
  0x38   :  { %v103_v43 = vrot.slane %v1216_v39, %v1410_v37  ;;  %v110_v46 = vrot.slane %v1219_v41, %v1410_v37  ;;  %v1224_v56 = vld [vmem:[#allocation5 + $0x170] sm:$0xff]   ;;  %v1229_v63 = vld [vmem:[#allocation5 + $0x1e8] sm:$0xff]   ;;  %v1232_v2 = vld [vmem:[#allocation5 + $0x160] sm:$0xff]  }
  0x39   :  { %1059 = vmatpush3.bf16.msra.mxu0 %v1196_v14  ;;  %v1225_v59 = vld [vmem:[#allocation5 + $0x1f0] sm:$0xff]   ;;  %v1230_v0 = vld [vmem:[#allocation5 + $0x128] sm:$0xff]   ;;  %v1233_v3 = vld [vmem:[#allocation5 + $0x1e0] sm:$0xff]  }
  0x3a   :  { %1081 = vmatpush3.bf16.msra.mxu1 %v1197_v15  ;;  %1060 = vmatprep.subr.bf16.mxu0 %v1198_v16  ;;  %v112_v48 = vcombine.high %v89_v42, %v103_v43  ;;  %v111_v49 = vcombine.low %v89_v42, %v103_v43  ;;  %v114_v51 = vcombine.high %v96_v45, %v110_v46  ;;  %v1226_v60 = vld [vmem:[#allocation5 + $0x130] sm:$0xff]   ;;  %v1231_v1 = vld [vmem:[#allocation5 + $0x1a8] sm:$0xff]   ;;  %v1234_v4 = vld [vmem:[#allocation5 + $0x120] sm:$0xff]  }
  0x3b   :  { %1082 = vmatprep.subr.bf16.mxu1 %v1199_v17  ;;  %v113_v52 = vcombine.low %v96_v45, %v110_v46  ;;  %v1227_v61 = vld [vmem:[#allocation5 + $0x1b0] sm:$0xff]   ;;  %v1235_v5 = vld [vmem:[#allocation5 + $0x1a0] sm:$0xff]   ;;  %v1236_v6 = vld [vmem:[#allocation5 + $0x158] sm:$0xff]  }
  0x3c   :  { %v160_v54 = vpack.c.bf16 %v112_v48, %v112_v48  ;;  %v159_v55 = vpack.c.bf16 %v111_v49, %v111_v49  ;;  %v162_v57 = vpack.c.bf16 %v114_v51, %v114_v51  ;;  %v1237_v7 = vld [vmem:[#allocation5 + $0x1d8] sm:$0xff]   ;;  %v1240_v10 = vld [vmem:[#allocation5 + $0x150] sm:$0xff]   ;;  %v1244_v14 = vld [vmem:[#allocation5 + $0x148] sm:$0xff]  }
  0x3d   :  { %1061 = vmatpush3.bf16.msra.mxu0 %v1200_v18  ;;  %v161_v58 = vpack.c.bf16 %v113_v52, %v113_v52  ;;  %v1238_v8 = vld [vmem:[#allocation5 + $0x118] sm:$0xff]   ;;  %v1241_v11 = vld [vmem:[#allocation5 + $0x1d0] sm:$0xff]   ;;  %v1245_v15 = vld [vmem:[#allocation5 + $0x1c8] sm:$0xff]  }
  0x3e   :  { %1083 = vmatpush3.bf16.msra.mxu1 %v1201_v19  ;;  %1062 = vmatprep.subr.bf16.mxu0 %v1202_v20  ;;  %v1239_v9 = vld [vmem:[#allocation5 + $0x198] sm:$0xff]   ;;  %v1242_v12 = vld [vmem:[#allocation5 + $0x110] sm:$0xff]   ;;  %v1246_v16 = vld [vmem:[#allocation5 + $0x108] sm:$0xff]  }
  0x3f   :  { %1084 = vmatprep.subr.bf16.mxu1 %v1203_v21  ;;  %718 = vmatprep.mubr.bf16.mxu0 %v160_v54  ;;  %v1243_v13 = vld [vmem:[#allocation5 + $0x190] sm:$0xff]   ;;  %v1247_v17 = vld [vmem:[#allocation5 + $0x188] sm:$0xff]   ;;  %v1248_v18 = vld [vmem:[#allocation5 + $0x140] sm:$0xff]  }
  0x40   :  { %758 = vmatprep.mubr.bf16.mxu1 %v162_v57  ;;  %v1249_v19 = vld [vmem:[#allocation5 + $0x1c0] sm:$0xff]   ;;  %v1256_v24 = vld [vmem:[#allocation2 + $0xc] ss:$16 sps:$4 sm:$0xff]   ;;  %v1259_v41 = vld [vmem:[#allocation7 + $0x30] sm:$0xff]  }
  0x41   :  { %1063 = vmatpush3.bf16.msra.mxu0 %v1204_v22  ;;  %v1250_v20 = vld [vmem:[#allocation5 + $0x100] sm:$0xff]   ;;  %v1252_v22 = vld [vmem:[#allocation2 + $0x8] ss:$16 sps:$4 sm:$0xff]   ;;  %v1257_v25 = vld [vmem:[#allocation2 + $0x2c] ss:$16 sps:$4 sm:$0xff]  }
  0x42   :  { %1085 = vmatpush3.bf16.msra.mxu1 %v1205_v23  ;;  %1064 = vmatprep.subr.bf16.mxu0 %v1206_v27  ;;  %v1251_v21 = vld [vmem:[#allocation5 + $0x180] sm:$0xff]   ;;  %v1254_v23 = vld [vmem:[#allocation2 + $0x28] ss:$16 sps:$4 sm:$0xff]   ;;  %v125_v26 = vrot.slane %v1252_v22, %v1410_v37 }
  0x43   :  { %1086 = vmatprep.subr.bf16.mxu1 %v1207_v28  ;;  %v139_v27 = vrot.slane %v1254_v23, %v1410_v37  ;;  %v132_v28 = vrot.slane %v1256_v24, %v1410_v37  ;;  %v1258_v39 = vld [vmem:[#allocation7 + $0x38] sm:$0xff]   ;;  %v1261_v42 = vld [vmem:[#allocation7 + $0x20] sm:$0xff]   ;;  %v1264_v45 = vld [vmem:[#allocation7 + $0x8] sm:$0xff]  }
  0x44   :  { %v1262_v43 = vld [vmem:[#allocation7 + $0x18] sm:$0xff]   ;;  %v1265_v46 = vld [vmem:[#allocation7] sm:$0xff]  }
  0x45   :  { %1065 = vmatpush3.bf16.msra.mxu0 %v1208_v29  ;;  %v146_v29 = vrot.slane %v1257_v25, %v1410_v37  ;;  %v147_v31 = vcombine.low %v125_v26, %v139_v27  ;;  %v1260_v37 = vld [vmem:[#allocation7 + $0x28] sm:$0xff]  }
  0x46   :  { %1087 = vmatpush3.bf16.msra.mxu1 %v1209_v30  ;;  %1066 = vmatprep.subr.bf16.mxu0 %v1210_v33  ;;  %v148_v30 = vcombine.high %v125_v26, %v139_v27 }
  0x47   :  { %1088 = vmatprep.subr.bf16.mxu1 %v1211_v34  ;;  %v150_v32 = vcombine.high %v132_v28, %v146_v29  ;;  %v149_v33 = vcombine.low %v132_v28, %v146_v29 }
  0x48   :  { %v164_v34 = vpack.c.bf16 %v148_v30, %v148_v30 }
  0x49   :  { %1067 = vmatpush3.bf16.msra.mxu0 %v1212_v35  ;;  %v163_v35 = vpack.c.bf16 %v147_v31, %v147_v31  ;;  %v165_v38 = vpack.c.bf16 %v149_v33, %v149_v33 }
  0x4a   :  { %1089 = vmatpush3.bf16.msra.mxu1 %v1213_v36  ;;  %1096 = vmatprep.subr.bf16.mxu0 %v1220_v44  ;;  %v166_v36 = vpack.c.bf16 %v150_v32, %v150_v32  ;;  %v1263_v44 = vld [vmem:[#allocation7 + $0x10] sm:$0xff]  }
  0x4b   :  { %1118 = vmatprep.subr.bf16.mxu1 %v1221_v47 }
  0x4c   :  { %719 = vmatmul.mubr.bf16.vlgmr.msra.gmra.mxu0 %v159_v55 }
  0x4d   :  { %759 = vmatmul.mubr.bf16.vlgmr.msra.gmra.mxu1 %v161_v58  ;;  %1097 = vmatpush3.bf16.msra.mxu0 %v1222_v50 }
  0x4e   :  { %1119 = vmatpush3.bf16.msra.mxu1 %v1223_v53  ;;  %1098 = vmatprep.subr.bf16.mxu0 %v1224_v56  ;;  %v978_v56 = vld [vmem:[%s1431_s2] ss:$0 sm:$0xff] }
  0x4f   :  { %1120 = vmatprep.subr.bf16.mxu1 %v1225_v59  ;;  %798 = vmatprep.mubr.bf16.mxu0 %v164_v34 }
  0x50   :  { %838 = vmatprep.mubr.bf16.mxu1 %v166_v36 }
  0x51   :  { %1099 = vmatpush3.bf16.msra.mxu0 %v1226_v60 }
  0x52   :  { %1121 = vmatpush3.bf16.msra.mxu1 %v1227_v61  ;;  %1100 = vmatprep.subr.bf16.mxu0 %v1228_v62 }
  0x53   :  { %1122 = vmatprep.subr.bf16.mxu1 %v1229_v63 }
  0x55   :  { %1101 = vmatpush3.bf16.msra.mxu0 %v1230_v0 }
  0x56   :  { %1123 = vmatpush3.bf16.msra.mxu1 %v1231_v1  ;;  %1102 = vmatprep.subr.bf16.mxu0 %v1232_v2 }
  0x57   :  { %1124 = vmatprep.subr.bf16.mxu1 %v1233_v3 }
  0x59   :  { %1103 = vmatpush3.bf16.msra.mxu0 %v1234_v4 }
  0x5a   :  { %1125 = vmatpush3.bf16.msra.mxu1 %v1235_v5  ;;  %1104 = vmatprep.subr.bf16.mxu0 %v1236_v6 }
  0x5b   :  { %1126 = vmatprep.subr.bf16.mxu1 %v1237_v7 }
  0x5d   :  { %1105 = vmatpush3.bf16.msra.mxu0 %v1238_v8 }
  0x5e   :  { %1127 = vmatpush3.bf16.msra.mxu1 %v1239_v9  ;;  %1106 = vmatprep.subr.bf16.mxu0 %v1240_v10  ;;  %v1043_v10 = vld [vmem:[%s1433_s4] ss:$0 sm:$0xff] }
  0x5f   :  { %1128 = vmatprep.subr.bf16.mxu1 %v1241_v11 }
  0x61   :  { %1107 = vmatpush3.bf16.msra.mxu0 %v1242_v12 }
  0x62   :  { %1129 = vmatpush3.bf16.msra.mxu1 %v1243_v13  ;;  %1108 = vmatprep.subr.bf16.mxu0 %v1244_v14 }
  0x63   :  { %1130 = vmatprep.subr.bf16.mxu1 %v1245_v15 }
  0x65   :  { %1109 = vmatpush3.bf16.msra.mxu0 %v1246_v16 }
  0x66   :  { %1131 = vmatpush3.bf16.msra.mxu1 %v1247_v17  ;;  %1110 = vmatprep.subr.bf16.mxu0 %v1248_v18 }
  0x67   :  { %1132 = vmatprep.subr.bf16.mxu1 %v1249_v19 }
  0x69   :  { %1111 = vmatpush3.bf16.msra.mxu0 %v1250_v20 }
  0x6a   :  { %1133 = vmatpush3.bf16.msra.mxu1 %v1251_v21  ;;  %1149 = vmatprep.subr.bf16.mxu0 %v1360_v40 }
  0x6c   :  { %799 = vmatmul.mubr.bf16.vlgmr.msra.gmra.mxu0 %v163_v35 }
  0x6d   :  { %839 = vmatmul.mubr.bf16.vlgmr.msra.gmra.mxu1 %v165_v38  ;;  %1150 = vmatpush3.bf16.msra.mxu0 %v1258_v39 }
  0x6e   :  { %1151 = vmatprep.subr.bf16.mxu0 %v1360_v40  ;;  %1165 = vmatprep.mubr.msk.bf16.mxu0 %vm1361_vm0, %v1360_v40 }
  0x71   :  { %1152 = vmatpush3.bf16.msra.mxu0 %v1259_v41 }
  0x72   :  { %1153 = vmatprep.subr.bf16.mxu0 %v1360_v40 }
  0x75   :  { %1154 = vmatpush3.bf16.msra.mxu0 %v1260_v37 }
  0x76   :  { %1155 = vmatprep.subr.bf16.mxu0 %v1360_v40 }
  0x79   :  { %1156 = vmatpush3.bf16.msra.mxu0 %v1261_v42 }
  0x7a   :  { %1157 = vmatprep.subr.bf16.mxu0 %v1360_v40 }
  0x7d   :  { %1158 = vmatpush3.bf16.msra.mxu0 %v1262_v43 }
  0x7e   :  { %1159 = vmatprep.subr.bf16.mxu0 %v1360_v40 }
  0x81   :  { %1160 = vmatpush3.bf16.msra.mxu0 %v1263_v44 }
  0x82   :  { %1161 = vmatprep.subr.bf16.mxu0 %v1360_v40 }
  0x85   :  { %1162 = vmatpush3.bf16.msra.mxu0 %v1264_v45 }
  0x86   :  { %1163 = vmatprep.subr.bf16.mxu0 %v1360_v40 }
  0x89   :  { %1164 = vmatpush3.bf16.msra.mxu0 %v1265_v46 }
 0x10c   :  { %v1068_v47 = vpop.f32.mrf.mxu0 }
 0x10d   :  { %v1090_v48 = vpop.f32.mrf.mxu1 }
 0x10e   :  { %v1069_v49 = vpop.f32.mrf.mxu0 }
 0x10f   :  { %v1091_v50 = vpop.f32.mrf.mxu1  ;;  %v1070_v55 = vadd.f32 %v1069_v49, %v1068_v47 }
 0x110   :  { %v1071_v51 = vpop.f32.mrf.mxu0  ;;  %v1092_v58 = vadd.f32 %v1091_v50, %v1090_v48 }
 0x111   :  { %v1093_v52 = vpop.f32.mrf.mxu1  ;;  %v721_v57 = vadd.f32 %v1070_v55, %v978_v56 }
 0x112   :  { %v1072_v53 = vpop.f32.mrf.mxu0 }
 0x113   :  { %v1094_v54 = vpop.f32.mrf.mxu1  ;;  %v761_v62 = vadd.f32 %v1092_v58, %v721_v57 }
 0x12c   :  { %v1112_v59 = vpop.f32.mrf.mxu0 }
 0x12d   :  { %v1134_v60 = vpop.f32.mrf.mxu1 }
 0x12e   :  { %v1113_v61 = vpop.f32.mrf.mxu0 }
 0x12f   :  { %v1114_v63 = vadd.f32 %v1113_v61, %v1112_v59  ;;  %v1135_v0 = vpop.f32.mrf.mxu1 }
 0x130   :  { %v1115_v1 = vpop.f32.mrf.mxu0  ;;  %v1136_v3 = vadd.f32 %v1135_v0, %v1134_v60 }
 0x131   :  { %v801_v2 = vadd.f32 %v1114_v63, %v761_v62  ;;  %v1137_v4 = vpop.f32.mrf.mxu1 }
 0x132   :  { %v1116_v5 = vpop.f32.mrf.mxu0 }
 0x133   :  { %v841_v6 = vadd.f32 %v1136_v3, %v801_v2  ;;  %v1138_v7 = vpop.f32.mrf.mxu1 }
 0x135   :  { %v846_v8 = vmax.f32 %v841_v6, 0.0 }
 0x137   :  { %v847_v9 = vpack.c.bf16 %v846_v8, %v846_v8 }
 0x139   :  { %1166 = vmatmul.mubr.bf16.vlgmr.msra.gmra.mxu0 %v847_v9 }
 0x1f9   :  { %v953_v11 = vpop.f32.mrf.mxu0 }
 0x1fa   :  { %v954_v12 = vadd.f32 %v1043_v10, %v953_v11 }
 0x1fb   :  { %v1167_v13 = vpop.f32.mrf.mxu0 }
 0x1fc   :  { %959 = vst [vmem:[#allocation8] sm:$0xff] %v954_v12 }
 0x1fd   :  { %v956_v14 = vpop.f32.mrf.mxu0 }
 0x1ff   :  { %v1168_v15 = vpop.f32.mrf.mxu0 }
 0x200   :  { %964 = vsyncadd [#allocation4], 96  ;;  %s1362_s13 = smov [#allocation8]  }
 0x201   :  { %s965_s14 = sshll.u32 %s1362_s13, 4  ;;  %s966_s14 = int_to_ptr.vmem [resolvable:$true] %s965_s14 }
 0x202   :  { %s1326_s15 = scalar_lea.vmem %s966_s14, 32  ;;  %s1330_s16 = scalar_lea.vmem %s966_s14, 128 }
 0x203   :  { %p1327_p1 = scmp.ne.s32.totalorder %s966_s14, %s1326_s15  ;;  %p1331_p2 = scmp.lt.s32.totalorder %s966_s14, %s966_s14 }
 0x204   :  { %p1332_p3 = scmp.lt.s32.totalorder %s1330_s16, %s1326_s15 }
 0x206   :  { %p1333_p4 = por %p1332_p3, %p1331_p2 }
 0x208   :  { %p1334_p5 = pnand %p1333_p4, %p1327_p1 }
 0x20a   :  { %1337 = shalt.err (!%p1334_p5)
}
 0x20b   :  { %s1363_s17 = smov 32   ;;  %s1364_s4 = smov 2  }
 0x20c   :  { %971 = dma.vmem_to_hbm [thread:$0]  %s966_s14, 32, %s1434_s5, [#allocation4], %s1363_s17, %s1363_s17, %s1364_s4  }
 0x20d   :  { %1350 = dma.done.wait [#allocation4], 128  }
 0x20e   :  { %1351 = vsyncadd [#allocation4], 4294967168 }
 0x20f   :  { %975 = vsyncpa [#allocation3], 1 }
 0x210   :  { %976 = vsyncpa [#allocation6], 1 }
 0x211   :  { %977 = vsyncpa [#allocation4], 1 }

</bundles_post_ra>
